<compile_context>
chip_gen: v7x
topology: tpu7x:2x2x1
jax: 0.10.0
libtpu: 0.0.40
codegen_flags: <defaults>
</compile_context>

<pallas_src>
import functools

import jax
import jax.numpy as jnp
import numpy as np
from jax import lax
from jax.experimental import pallas as pl
from jax.experimental.pallas import tpu as pltpu


def _elu(v):
    # ELU with alpha=1; clamp the exp argument so the unselected branch is safe.
    return jnp.where(v > 0, v, jnp.exp(jnp.minimum(v, 0.0)) - 1.0)


def conv_emb_kernel(pT_ref, rhsT_ref, w2c_ref, wlinbd_ref, xb_ref, o_ref):
    # pT_ref    : (K1pad, B*M)    bf16  transposed/padded patches, batch in lanes
    #                                   (row K1 is the constant-1 bias lane)
    # rhsT_ref  : (C4+1, K1pad)   bf16  rows 0..C4-1 = conv1 weight (+b1 in bias
    #                                   col); row C4 = conv2-pool weights folded
    #                                   through the avg-pool matrix (+b2)
    # w2c_ref   : (C4, 1)         f32   conv2 1x1 weights for the conv1 channels
    # wlinbd_ref: (B*M, B*O)      bf16  block-diagonal kron(I_B, wlin^T)
    # xb_ref    : (1, B*O)        f32   x + blin, flattened (residual + bias)
    # o_ref     : (1, B*O)        f32
    C4 = w2c_ref.shape[0]

    # Fused conv1 + (w2-weighted avg-pool + b2), all batches at once:
    # (C4+1, K1pad) @ (K1pad, B*M) -> (C4+1, B*M), f32 accumulation on the MXU.
    hp = jnp.dot(rhsT_ref[...], pT_ref[...], preferred_element_type=jnp.float32)

    # conv2 pre-activation: pool part is already in row C4; conv1 rows get ELU
    # then the w2-weighted channel sum (VPU mul + sublane reduce).
    conv1 = _elu(hp[:C4, :])                                            # (C4, B*M)
    e = hp[C4:C4 + 1, :] + jnp.sum(conv1 * w2c_ref[...], axis=0,
                                   keepdims=True)                       # (1, B*M)
    e = _elu(e)

    # Linear (block-diagonal over the batch), lane-dense output row:
    # (1, B*M) @ (B*M, B*O) -> (1, B*O); + (x + blin), final ELU.
    out = jnp.dot(e.astype(wlinbd_ref.dtype), wlinbd_ref[...],
                  preferred_element_type=jnp.float32)                   # (1, B*O)
    o_ref[...] = _elu(out + xb_ref[...])


def im2col(y, kh, kw, sh, sw):
    """y: (B, C, H, W) -> patches (B, Ho*Wo, C*kh*kw), channel-major columns."""
    B, C, H, W = y.shape
    Ho = (H - kh) // sh + 1
    Wo = (W - kw) // sw + 1
    slices = []
    for di in range(kh):
        for dj in range(kw):
            slices.append(y[:, :, di:di + sh * (Ho - 1) + 1:sh,
                              dj:dj + sw * (Wo - 1) + 1:sw])       # (B,C,Ho,Wo)
    stk = jnp.stack(slices, axis=2)                                # (B,C,kh*kw,Ho,Wo)
    stk = jnp.transpose(stk, (0, 3, 4, 1, 2))                      # (B,Ho,Wo,C,kh*kw)
    return stk.reshape(B, Ho * Wo, C * kh * kw), Ho, Wo


def conv_emb_forward(x, y, params, kh, kw, sh, sw):
    B, C, H, W = y.shape
    patches, Ho, Wo = im2col(y.astype(jnp.float32), kh, kw, sh, sw)  # (B, M, K1)
    M = Ho * Wo
    K1 = C * kh * kw
    C4 = 4 * C
    O = params["wlin"].shape[0]
    BM = B * M
    K1pad = ((K1 + 1 + 127) // 128) * 128          # +1 for the bias lane

    # Transposed, zero-padded patches with batch folded into lanes and a
    # constant-1 "bias" row at index K1:  pT[k, b*M + m] = patches[b, m, k].
    pT = jnp.transpose(patches, (2, 0, 1)).reshape(K1, BM)           # (K1, B*M)
    pT = jnp.concatenate(
        [pT,
         jnp.ones((1, BM), jnp.float32),
         jnp.zeros((K1pad - K1 - 1, BM), jnp.float32)], axis=0)
    pT = pT.astype(jnp.bfloat16)                                     # (K1pad, B*M)

    # Fused RHS^T: rows 0..C4-1 = conv1 weight (b1 in the bias column);
    # row C4 = conv2's pool weights pushed through the avg-pool averaging
    # (w2[c]/(kh*kw) repeated over the kh*kw taps), with b2 in the bias column.
    w2flat = params["w2"].reshape(5 * C).astype(jnp.float32)
    w1_2d = params["w1"].reshape(C4, K1).astype(jnp.float32)
    pool_row = (jnp.repeat(w2flat[:C], kh * kw) / float(kh * kw)).reshape(1, K1)
    body = jnp.concatenate([w1_2d, pool_row], axis=0)                # (C4+1, K1)
    bias_col = jnp.concatenate(
        [params["b1"].astype(jnp.float32),
         params["b2"].reshape(1).astype(jnp.float32)]).reshape(C4 + 1, 1)
    rhsT = jnp.concatenate(
        [body, bias_col, jnp.zeros((C4 + 1, K1pad - K1 - 1), jnp.float32)],
        axis=1).astype(jnp.bfloat16)                                 # (C4+1, K1pad)

    w2c = w2flat[C:].reshape(C4, 1)                                  # (C4, 1) f32

    # Block-diagonal Linear RHS and the residual (blin folded in), flattened
    # to match the (1, B*O) lane-dense kernel output.
    wlin_bd = jnp.kron(jnp.eye(B, dtype=jnp.float32),
                       params["wlin"].T.astype(jnp.float32)
                       ).astype(jnp.bfloat16)                        # (B*M, B*O)
    xb = (x.astype(jnp.float32)
          + params["blin"].reshape(1, O)).reshape(1, B * O)          # (1, B*O)

    vmem = pltpu.MemorySpace.VMEM
    out = pl.pallas_call(
        conv_emb_kernel,
        out_shape=jax.ShapeDtypeStruct((1, B * O), jnp.float32),
        in_specs=[
            pl.BlockSpec(memory_space=vmem),     # pT
            pl.BlockSpec(memory_space=vmem),     # rhsT
            pl.BlockSpec(memory_space=vmem),     # w2c
            pl.BlockSpec(memory_space=vmem),     # wlin_bd
            pl.BlockSpec(memory_space=vmem),     # xb
        ],
        out_specs=pl.BlockSpec(memory_space=vmem),
    )(pT, rhsT, w2c, wlin_bd, xb)
    return out.reshape(B, O)


def conv_emb_reference(x, y, params, kh, kw, sh, sw):
    """Pure-JAX reference mirroring the PyTorch module exactly (NCHW)."""
    B, C, H, W = y.shape
    dn = ("NCHW", "OIHW", "NCHW")
    c1 = lax.conv_general_dilated(y, params["w1"], (sh, sw), "VALID",
                                  dimension_numbers=dn)
    c1 = _elu(c1 + params["b1"].reshape(1, -1, 1, 1))
    pool = lax.reduce_window(y, 0.0, lax.add, (1, 1, kh, kw),
                             (1, 1, sh, sw), "VALID") / float(kh * kw)
    cat = jnp.concatenate([pool, c1], axis=1)
    c2 = lax.conv_general_dilated(cat, params["w2"], (1, 1), "VALID",
                                  dimension_numbers=dn)
    c2 = _elu(c2 + params["b2"].reshape(1, -1, 1, 1))
    flat = c2.reshape(B, -1)
    out = flat @ params["wlin"].T + params["blin"] + x
    return _elu(out)


def init_params(key, C, kh, kw, M, output_lg):
    ks = jax.random.split(key, 6)
    C4 = 4 * C

    def u(k, shape, fan_in):
        b = 1.0 / np.sqrt(fan_in)
        return jax.random.uniform(k, shape, jnp.float32, -b, b)

    return {
        "w1": u(ks[0], (C4, C, kh, kw), C * kh * kw),
        "b1": u(ks[1], (C4,), C * kh * kw),
        "w2": u(ks[2], (1, 5 * C, 1, 1), 5 * C),
        "b2": u(ks[3], (1,), 5 * C),
        "wlin": u(ks[4], (output_lg, M), M),
        "blin": u(ks[5], (output_lg,), M),
    }


if __name__ == "__main__":
    # input_dim = [B, C, H, W] = [2, 4, 16, 16], output_lg = 32
    B, C, H, W = 2, 4, 16, 16
    output_lg = 32

    # Mirror the module's __init__ arithmetic (torch.clamp(..., 1)).
    kh, kw = max(H // 3, 1), max(W // 3, 1)                        # (5, 5)
    sh, sw = max((H - kh) // 7, 1), max((W - kw) // 7, 1)          # (1, 1)
    Ho, Wo = (H - kh) // sh + 1, (W - kw) // sw + 1                # (12, 12)
    M = Ho * Wo                                                    # 144 (Linear in-features)

    key = jax.random.PRNGKey(0)
    kx, ky, kp = jax.random.split(key, 3)
    x = jax.random.normal(kx, (B, output_lg), jnp.float32)
    y = jax.random.normal(ky, (B, C, H, W), jnp.float32)
    params = init_params(kp, C, kh, kw, M, output_lg)

    fwd = functools.partial(conv_emb_forward, kh=kh, kw=kw, sh=sh, sw=sw)
    out = jax.jit(fwd)(x, y, params)
    out = jax.block_until_ready(out)

    ref = conv_emb_reference(x, y, params, kh, kw, sh, sw)
    # Matmul operands are bf16 (accumulation f32) -> ~1e-3-scale rounding.
    np.testing.assert_allclose(np.asarray(out), np.asarray(ref),
                               rtol=1e-2, atol=1e-2)
    print("KERNEL_OK")
</pallas_src>

<mosaic_0001>
module attributes {stable_mosaic.version = 11 : i64} {
  func.func @conv_emb_kernel(%arg0: memref<128x288xbf16, #tpu.memory_space<vmem>>, %arg1: memref<17x128xbf16, #tpu.memory_space<vmem>>, %arg2: memref<16x1xf32, #tpu.memory_space<vmem>>, %arg3: memref<288x64xbf16, #tpu.memory_space<vmem>>, %arg4: memref<1x64xf32, #tpu.memory_space<vmem>>, %arg5: memref<1x64xf32, #tpu.memory_space<vmem>>) attributes {dimension_semantics = [], scalar_prefetch = 0 : i64, scratch_operands = 0 : i64, tpu.core_type = #tpu.core_type<tc>} {
    %c0 = arith.constant 0 : index
    %c0_0 = arith.constant 0 : index
    %0 = vector.load %arg1[%c0, %c0_0] : memref<17x128xbf16, #tpu.memory_space<vmem>>, vector<17x128xbf16>
    %c0_1 = arith.constant 0 : index
    %c0_2 = arith.constant 0 : index
    %1 = vector.load %arg0[%c0_1, %c0_2] : memref<128x288xbf16, #tpu.memory_space<vmem>>, vector<128x288xbf16>
    %cst = arith.constant dense<0.000000e+00> : vector<17x288xf32>
    %2 = tpu.matmul %0, %1, %cst {dimension_numbers = #tpu.dot_dimension_numbers<[1], [0], [0], [1], [0, 0, 1, 1], [], []>} : vector<17x128xbf16>, vector<128x288xbf16>, vector<17x288xf32> -> vector<17x288xf32>
    %3 = vector.extract_strided_slice %2 {offsets = [0, 0], sizes = [16, 288], strides = [1, 1]} : vector<17x288xf32> to vector<16x288xf32>
    %cst_3 = arith.constant 0.000000e+00 : f32
    %4 = vector.broadcast %cst_3 : f32 to vector<16x288xf32>
    %5 = arith.cmpf ogt, %3, %4 : vector<16x288xf32>
    %cst_4 = arith.constant 0.000000e+00 : f32
    %6 = vector.broadcast %cst_4 : f32 to vector<16x288xf32>
    %7 = arith.minimumf %3, %6 : vector<16x288xf32>
    %8 = math.exp %7 : vector<16x288xf32>
    %cst_5 = arith.constant 1.000000e+00 : f32
    %9 = vector.broadcast %cst_5 : f32 to vector<16x288xf32>
    %10 = arith.subf %8, %9 : vector<16x288xf32>
    %11 = arith.select %5, %3, %10 : vector<16x288xi1>, vector<16x288xf32>
    %12 = vector.extract_strided_slice %2 {offsets = [16, 0], sizes = [1, 288], strides = [1, 1]} : vector<17x288xf32> to vector<1x288xf32>
    %c0_6 = arith.constant 0 : index
    %c0_7 = arith.constant 0 : index
    %13 = vector.load %arg2[%c0_6, %c0_7] : memref<16x1xf32, #tpu.memory_space<vmem>>, vector<16x1xf32>
    %14 = vector.broadcast %13 : vector<16x1xf32> to vector<16x288xf32>
    %15 = arith.mulf %11, %14 : vector<16x288xf32>
    %cst_8 = arith.constant dense<0.000000e+00> : vector<288xf32>
    %16 = vector.multi_reduction <add>, %15, %cst_8 [0] : vector<16x288xf32> to vector<288xf32>
    %17 = vector.shape_cast %16 : vector<288xf32> to vector<1x288xf32>
    %18 = arith.addf %12, %17 : vector<1x288xf32>
    %cst_9 = arith.constant 0.000000e+00 : f32
    %19 = vector.broadcast %cst_9 : f32 to vector<1x288xf32>
    %20 = arith.cmpf ogt, %18, %19 : vector<1x288xf32>
    %cst_10 = arith.constant 0.000000e+00 : f32
    %21 = vector.broadcast %cst_10 : f32 to vector<1x288xf32>
    %22 = arith.minimumf %18, %21 : vector<1x288xf32>
    %23 = math.exp %22 : vector<1x288xf32>
    %cst_11 = arith.constant 1.000000e+00 : f32
    %24 = vector.broadcast %cst_11 : f32 to vector<1x288xf32>
    %25 = arith.subf %23, %24 : vector<1x288xf32>
    %26 = arith.select %20, %18, %25 : vector<1x288xi1>, vector<1x288xf32>
    %27 = arith.truncf %26 : vector<1x288xf32> to vector<1x288xbf16>
    %c0_12 = arith.constant 0 : index
    %c0_13 = arith.constant 0 : index
    %28 = vector.load %arg3[%c0_12, %c0_13] : memref<288x64xbf16, #tpu.memory_space<vmem>>, vector<288x64xbf16>
    %cst_14 = arith.constant dense<0.000000e+00> : vector<1x64xf32>
    %29 = tpu.matmul %27, %28, %cst_14 {dimension_numbers = #tpu.dot_dimension_numbers<[1], [0], [0], [1], [0, 0, 1, 1], [], []>} : vector<1x288xbf16>, vector<288x64xbf16>, vector<1x64xf32> -> vector<1x64xf32>
    %c0_15 = arith.constant 0 : index
    %c0_16 = arith.constant 0 : index
    %30 = vector.load %arg4[%c0_15, %c0_16] : memref<1x64xf32, #tpu.memory_space<vmem>>, vector<1x64xf32>
    %31 = arith.addf %29, %30 : vector<1x64xf32>
    %cst_17 = arith.constant 0.000000e+00 : f32
    %32 = vector.broadcast %cst_17 : f32 to vector<1x64xf32>
    %33 = arith.cmpf ogt, %31, %32 : vector<1x64xf32>
    %cst_18 = arith.constant 0.000000e+00 : f32
    %34 = vector.broadcast %cst_18 : f32 to vector<1x64xf32>
    %35 = arith.minimumf %31, %34 : vector<1x64xf32>
    %36 = math.exp %35 : vector<1x64xf32>
    %cst_19 = arith.constant 1.000000e+00 : f32
    %37 = vector.broadcast %cst_19 : f32 to vector<1x64xf32>
    %38 = arith.subf %36, %37 : vector<1x64xf32>
    %39 = arith.select %33, %31, %38 : vector<1x64xi1>, vector<1x64xf32>
    %c0_20 = arith.constant 0 : index
    %c0_21 = arith.constant 0 : index
    %40 = vector.load %arg5[%c0_20, %c0_21] : memref<1x64xf32, #tpu.memory_space<vmem>>, vector<1x64xf32>
    tpu.vector_store %arg5[%c0_20, %c0_21], %39 {strides = array<i32>} : memref<1x64xf32, #tpu.memory_space<vmem>>, vector<1x64xf32>,
    return
  }
}

</mosaic_0001>

<bundles_post_ra>
// kernel: conv_emb_forward.1
= control target key start
LH: loop header
LB: loop body
LE: loop exit
PB: predicated region body
PF: predicated region fallthrough
CT: control target
= control target key end

     0   :  { %v829_v1 = vmov 0   ;;  %v830_v44 = vmov 0.0   ;;  %vm831_vm0 = vmmov 0   ;;  %vm361_vm7 = vcmask 261120   ;;  %s1015_s0 = inlined_call_operand.vmem [shape: bf16[128,288], index: 0, kind: input, shape index: {}]   ;;  %s1016_s1 = inlined_call_operand.vmem [shape: bf16[17,128], index: 1, kind: input, shape index: {}]   ;;  %s1017_s2 = inlined_call_operand.vmem [shape: f32[16,1], index: 2, kind: input, shape index: {}]   ;;  %s1018_s3 = inlined_call_operand.vmem [shape: bf16[288,64], index: 3, kind: input, shape index: {}]   ;;  %s1019_s4 = inlined_call_operand.vmem [shape: f32[1,64], index: 4, kind: input, shape index: {}]   ;;  %s1020_s5 = inlined_call_operand.vmem [shape: f32[1,64], index: 5, kind: output, shape index: {}]  }
   0x1   :  { %v757_v0 = vld [vmem:[%s1015_s0 + $0x4] ss:$12 sps:$4 sm:$0xff]   ;;  %226 = vmatprep.mubr.bf16.mxu0 %v829_v1  ;;  %756 = vset.pattern.permute.xlu0 %v829_v1  ;;  %v759_v2 = vld [vmem:[%s1015_s0 + $0x8] ss:$12 sps:$4 sm:$0xff]   ;;  %v760_v3 = vld [vmem:[%s1015_s0] ss:$12 sps:$4 sm:$0xff]  }
   0x2   :  { %194 = vmatprep.subr.bf16.mxu0 %v757_v0  ;;  %725 = vmatprep.subr.bf16.mxu1 %v759_v2  ;;  %v761_v4 = vld [vmem:[%s1015_s0 + $0x1c] ss:$12 sps:$4 sm:$0xff]   ;;  %v763_v5 = vld [vmem:[%s1015_s0 + $0x20] ss:$12 sps:$4 sm:$0xff]   ;;  %v764_v6 = vld [vmem:[%s1015_s0 + $0x18] ss:$12 sps:$4 sm:$0xff]  }
   0x3   :  { %195 = vmatpush1.bf16.msra.mxu0 %v760_v3  ;;  %726 = vmatpush3.bf16.msra.mxu1 %v759_v2  ;;  %v765_v7 = vld [vmem:[%s1015_s0 + $0x34] ss:$12 sps:$4 sm:$0xff]   ;;  %v767_v8 = vld [vmem:[%s1015_s0 + $0x38] ss:$12 sps:$4 sm:$0xff]   ;;  %v768_v9 = vld [vmem:[%s1015_s0 + $0x30] ss:$12 sps:$4 sm:$0xff]  }
   0x4   :  { %196 = vmatprep.subr.bf16.mxu0 %v761_v4  ;;  %727 = vmatprep.subr.bf16.mxu1 %v763_v5  ;;  %v769_v10 = vld [vmem:[%s1015_s0 + $0x4c] ss:$12 sps:$4 sm:$0xff]   ;;  %v771_v11 = vld [vmem:[%s1015_s0 + $0x50] ss:$12 sps:$4 sm:$0xff]   ;;  %v772_v12 = vld [vmem:[%s1015_s0 + $0x48] ss:$12 sps:$4 sm:$0xff]  }
   0x5   :  { %v773_v13 = vld [vmem:[%s1015_s0 + $0x64] ss:$12 sps:$4 sm:$0xff]   ;;  %v775_v14 = vld [vmem:[%s1015_s0 + $0x68] ss:$12 sps:$4 sm:$0xff]   ;;  %v776_v15 = vld [vmem:[%s1015_s0 + $0x60] ss:$12 sps:$4 sm:$0xff]  }
   0x6   :  { %v777_v16 = vld [vmem:[%s1015_s0 + $0x7c] ss:$12 sps:$4 sm:$0xff]   ;;  %v779_v17 = vld [vmem:[%s1015_s0 + $0x80] ss:$12 sps:$4 sm:$0xff]   ;;  %v780_v19 = vld [vmem:[%s1015_s0 + $0x78] ss:$12 sps:$4 sm:$0xff]  }
   0x7   :  { %197 = vmatpush1.bf16.msra.mxu0 %v764_v6  ;;  %728 = vmatpush3.bf16.msra.mxu1 %v763_v5  ;;  %v789_v18 = vld [vmem:[%s1016_s1] sm:$0xff]   ;;  %v330_v23 = vld [vmem:[%s1017_s2 + $0x8] sm:$0xff]  ;;  %v784_v24 = vld [vmem:[%s1015_s0 + $0x90] ss:$12 sps:$4 sm:$0xff]   ;;  %vm629_vm11 = vcmask 516096  }
   0x8   :  { %198 = vmatprep.subr.bf16.mxu0 %v765_v7  ;;  %729 = vmatprep.subr.bf16.mxu1 %v767_v8  ;;  %v329_v20 = vld [vmem:[%s1017_s2] sm:$0xff]  ;;  %v785_v25 = vld [vmem:[%s1015_s0 + $0xac] ss:$12 sps:$4 sm:$0xff]   ;;  %v787_v26 = vld [vmem:[%s1015_s0 + $0xb0] ss:$12 sps:$4 sm:$0xff]  }
   0x9   :  { %v781_v21 = vld [vmem:[%s1015_s0 + $0x94] ss:$12 sps:$4 sm:$0xff]   ;;  %v783_v22 = vld [vmem:[%s1015_s0 + $0x98] ss:$12 sps:$4 sm:$0xff]   ;;  %741 = vmatprep.mubr.bf16.mxu1 %v789_v18  ;;  %333 = vperm.xlu0 %756, %v329_v20   ;;  %v793_v31 = vld [vmem:[%s1018_s3 + $0x48] sm:$0xff]  }
   0xa   :  { %v788_v27 = vld [vmem:[%s1015_s0 + $0xa8] ss:$12 sps:$4 sm:$0xff]   ;;  %v791_v29 = vld [vmem:[%s1018_s3 + $0x40] sm:$0xff]   ;;  %v797_v35 = vld [vmem:[%s1018_s3 + $0x58] sm:$0xff]  }
   0xb   :  { %199 = vmatpush1.bf16.msra.mxu0 %v768_v9  ;;  %730 = vmatpush3.bf16.msra.mxu1 %v767_v8  ;;  %v790_v28 = vld [vmem:[%s1016_s1 + $0x8] ss:$0 sps:$4 sm:$0x11]   ;;  %v792_v30 = vld [vmem:[%s1018_s3] sm:$0xff]   ;;  %v795_v33 = vld [vmem:[%s1018_s3 + $0x50] sm:$0xff]  }
   0xc   :  { %200 = vmatprep.subr.bf16.mxu0 %v769_v10  ;;  %731 = vmatprep.subr.bf16.mxu1 %v771_v11  ;;  %v794_v32 = vld [vmem:[%s1018_s3 + $0x8] sm:$0xff]   ;;  %v796_v34 = vld [vmem:[%s1018_s3 + $0x10] sm:$0xff]   ;;  %v798_v36 = vld [vmem:[%s1018_s3 + $0x18] sm:$0xff]  }
   0xd   :  { %338 = vperm.xlu0 %756, %v330_v23   ;;  %v799_v37 = vld [vmem:[%s1018_s3 + $0x60] sm:$0xff]   ;;  %v801_v39 = vld [vmem:[%s1018_s3 + $0x68] sm:$0xff]   ;;  %v803_v41 = vld [vmem:[%s1018_s3 + $0x70] sm:$0xff]  }
   0xe   :  { %v800_v38 = vld [vmem:[%s1018_s3 + $0x20] sm:$0xff]   ;;  %v802_v40 = vld [vmem:[%s1018_s3 + $0x28] sm:$0xff]   ;;  %v804_v42 = vld [vmem:[%s1018_s3 + $0x30] sm:$0xff]  }
   0xf   :  { %201 = vmatpush1.bf16.msra.mxu0 %v772_v12  ;;  %732 = vmatpush3.bf16.msra.mxu1 %v771_v11  ;;  %v805_v43 = vld [vmem:[%s1018_s3 + $0x80] sm:$0xff]   ;;  %v806_v45 = vld [vmem:[%s1018_s3 + $0x78] sm:$0xff]   ;;  %v808_v47 = vld [vmem:[%s1018_s3 + $0x88] sm:$0xff]  }
  0x10   :  { %202 = vmatprep.subr.bf16.mxu0 %v773_v13  ;;  %733 = vmatprep.subr.bf16.mxu1 %v775_v14  ;;  %v807_v46 = vld [vmem:[%s1018_s3 + $0x38] sm:$0xff]  }
  0x13   :  { %203 = vmatpush1.bf16.msra.mxu0 %v776_v15  ;;  %734 = vmatpush3.bf16.msra.mxu1 %v775_v14 }
  0x14   :  { %204 = vmatprep.subr.bf16.mxu0 %v777_v16  ;;  %735 = vmatprep.subr.bf16.mxu1 %v779_v17 }
  0x17   :  { %205 = vmatpush1.bf16.msra.mxu0 %v780_v19  ;;  %736 = vmatpush3.bf16.msra.mxu1 %v779_v17 }
  0x18   :  { %206 = vmatprep.subr.bf16.mxu0 %v781_v21  ;;  %737 = vmatprep.subr.bf16.mxu1 %v783_v22 }
  0x1b   :  { %207 = vmatpush1.bf16.msra.mxu0 %v784_v24  ;;  %738 = vmatpush3.bf16.msra.mxu1 %v783_v22 }
  0x1c   :  { %208 = vmatprep.subr.bf16.mxu0 %v785_v25  ;;  %739 = vmatprep.subr.bf16.mxu1 %v787_v26 }
  0x1f   :  { %209 = vmatpush1.bf16.msra.mxu0 %v788_v27  ;;  %740 = vmatpush3.bf16.msra.mxu1 %v787_v26 }
  0x20   :  { %700 = vmatprep.subr.bf16.mxu0 %v791_v29  ;;  %745 = vmatprep.subr.bf16.mxu1 %v830_v44 }
  0x22   :  { %227 = vmatmul.mubr.bf16.vlgmr.msra.gmra.mrb[0].mxu0 %v789_v18  ;;  %742 = vmatmul.mubr.bf16.vlgmr.msra.gmra.mrb[0].mxu1 %v790_v28 }
  0x23   :  { %236 = vmatprep.mubr.bf16.mxu0 %v829_v1  ;;  %701 = vmatpush3.bf16.msra.mxu0 %v792_v30 }
  0x24   :  { %702 = vmatprep.subr.bf16.mxu0 %v793_v31  ;;  %746 = vmatpush3.bf16.msra.mxu1 %v805_v43 }
  0x25   :  { %747 = vmatprep.subr.bf16.mxu1 %v830_v44  ;;  %749 = vmatprep.mubr.msk.bf16.mxu1 %vm831_vm0, %v830_v44 }
  0x27   :  { %703 = vmatpush3.bf16.msra.mxu0 %v794_v32 }
  0x28   :  { %704 = vmatprep.subr.bf16.mxu0 %v795_v33  ;;  %748 = vmatpush3.bf16.msra.mxu1 %v808_v47 }
  0x2a   :  { %237 = vmatmul.mubr.bf16.gmra.mrb[4].mxu0 %v790_v28 }
  0x2b   :  { %705 = vmatpush3.bf16.msra.mxu0 %v796_v34 }
  0x2c   :  { %706 = vmatprep.subr.bf16.mxu0 %v797_v35 }
  0x2f   :  { %707 = vmatpush3.bf16.msra.mxu0 %v798_v36 }
  0x30   :  { %708 = vmatprep.subr.bf16.mxu0 %v799_v37 }
  0x33   :  { %709 = vmatpush3.bf16.msra.mxu0 %v800_v38 }
  0x34   :  { %710 = vmatprep.subr.bf16.mxu0 %v801_v39 }
  0x37   :  { %711 = vmatpush3.bf16.msra.mxu0 %v802_v40 }
  0x38   :  { %712 = vmatprep.subr.bf16.mxu0 %v803_v41 }
  0x3b   :  { %713 = vmatpush3.bf16.msra.mxu0 %v804_v42 }
  0x3c   :  { %714 = vmatprep.subr.bf16.mxu0 %v806_v45 }
  0x3f   :  { %715 = vmatpush3.bf16.msra.mxu0 %v807_v46 }
  0x88   :  { %v334_v9 = vpop.permute.xlu0 %333 }
  0x8c   :  { %v339_v23 = vpop.permute.xlu0 %338 }
  0xf5   :  { %v228_v48 = vpop.f32.mrb[0].mxu0  ;;  %v1003_v49 = vpop.f32.mrb[0].mxu1 }
  0xf6   :  { %v299_v50 = vmin.f32 %v228_v48, 0.0  ;;  %v230_v51 = vpop.f32.mrb[1].mxu0  ;;  %v279_v52 = vpop.f32.mrb[1].mxu1  ;;  %vm293_vm1 = vcmp.gt.f32.partialorder %v228_v48, 0.0 }
  0xf7   :  { %v300_v53 = vmin.f32 %v230_v51, 0.0  ;;  %v301_v54 = vmin.f32 %v279_v52, 0.0  ;;  %v232_v55 = vpop.f32.mrb[2].mxu0  ;;  %v744_v56 = vpop.f32.mrb[2].mxu1  ;;  %vm294_vm2 = vcmp.gt.f32.partialorder %v230_v51, 0.0  ;;  %vm295_vm3 = vcmp.gt.f32.partialorder %v279_v52, 0.0 }
  0xf8   :  { %v305_v57 = vmul.f32 1.442695, %v299_v50  ;;  %v302_v58 = vmin.f32 %v232_v55, 0.0  ;;  %v234_v59 = vpop.f32.mrb[3].mxu0  ;;  %v282_v60 = vpop.f32.mrb[3].mxu1  ;;  %vm296_vm4 = vcmp.gt.f32.partialorder %v232_v55, 0.0 }
  0xf9   :  { %v307_v61 = vmul.f32 1.442695, %v300_v53  ;;  %v309_v62 = vmul.f32 1.442695, %v301_v54  ;;  %v303_v63 = vmin.f32 %v234_v59, 0.0  ;;  %v304_v1 = vmin.f32 %v282_v60, 0.0 }
  0xfa   :  { %809 = vpow2.f32 %v305_v57  ;;  %v311_v0 = vmul.f32 1.442695, %v302_v58  ;;  %vm297_vm5 = vcmp.gt.f32.partialorder %v234_v59, 0.0  ;;  %vm298_vm6 = vcmp.gt.f32.partialorder %v282_v60, 0.0 }
  0xfb   :  { %811 = vpow2.f32 %v307_v61  ;;  %v313_v2 = vmul.f32 1.442695, %v303_v63  ;;  %v315_v3 = vmul.f32 1.442695, %v304_v1 }
  0xfc   :  { %813 = vpow2.f32 %v309_v62 }
  0xfd   :  { %815 = vpow2.f32 %v311_v0  ;;  %v238_v4 = vpop.f32.mrb[4].mxu0 }
  0xfe   :  { %817 = vpow2.f32 %v313_v2  ;;  %v240_v5 = vpop.f32.mrb[5].mxu0 }
  0xff   :  { %819 = vpow2.f32 %v315_v3  ;;  %v242_v6 = vpop.f32.mrb[6].mxu0 }
 0x100   :  { %v243_v7 = vpop.f32.mrb[7].mxu0 }
 0x104   :  { %v810_v8 = vpop.eup %809 }
 0x105   :  { %v812_v10 = vpop.eup %811  ;;  %v661_v11 = vadd.f32 -1.0, %v810_v8 }
 0x106   :  { %v814_v12 = vpop.eup %813  ;;  %v662_v13 = vadd.f32 -1.0, %v812_v10 }
 0x107   :  { %v816_v14 = vpop.eup %815  ;;  %v663_v15 = vadd.f32 -1.0, %v814_v12  ;;  %v323_v17 = vsel %vm293_vm1, %v228_v48, %v661_v11 }
 0x108   :  { %v818_v16 = vpop.eup %817  ;;  %v664_v18 = vadd.f32 -1.0, %v816_v14  ;;  %v324_v20 = vsel %vm294_vm2, %v230_v51, %v662_v13  ;;  %v341_v26 = vmul.f32 %v334_v9, %v323_v17 }
 0x109   :  { %v820_v19 = vpop.eup %819  ;;  %v325_v21 = vsel %vm295_vm3, %v279_v52, %v663_v15  ;;  %v665_v22 = vadd.f32 -1.0, %v818_v16  ;;  %v342_v30 = vmul.f32 %v334_v9, %v324_v20  ;;  %v431_v16 = vld [vmem:[%s1019_s4] sm:$0x1] }
 0x10a   :  { %v666_v24 = vadd.f32 -1.0, %v820_v19  ;;  %v326_v25 = vsel %vm296_vm4, %v232_v55, %v664_v18  ;;  %v343_v27 = vmul.f32 %v334_v9, %v325_v21 }
 0x10b   :  { %v327_v28 = vsel %vm297_vm5, %v234_v59, %v665_v22  ;;  %v344_v29 = vmul.f32 %v339_v23, %v326_v25 }
 0x10c   :  { %v328_v31 = vsel %vm298_vm6, %v282_v60, %v666_v24  ;;  %v345_v32 = vmul.f32 %v339_v23, %v327_v28  ;;  %v362_v36 = vsel %vm361_vm7, %v343_v27, 0.0 }
 0x10d   :  { %v346_v33 = vmul.f32 %v339_v23, %v328_v31  ;;  %v347_v34 = vadd.f32 %v344_v29, %v341_v26 }
 0x10e   :  { %v354_v35 = vadd.f32 %v345_v32, %v342_v30 }
 0x10f   :  { %v348_v37 = vrot.slane %v347_v34, 4  ;;  %v363_v38 = vsel %vm361_vm7, %v346_v33, 0.0 }
 0x110   :  { %v355_v39 = vrot.slane %v354_v35, 4  ;;  %v364_v40 = vadd.f32 %v363_v38, %v362_v36 }
 0x111   :  { %v349_v41 = vadd.f32 %v348_v37, %v347_v34 }
 0x112   :  { %v356_v42 = vadd.f32 %v355_v39, %v354_v35  ;;  %v365_v43 = vrot.slane %v364_v40, 4 }
 0x113   :  { %v350_v44 = vrot.slane %v349_v41, 2 }
 0x114   :  { %v366_v45 = vadd.f32 %v365_v43, %v364_v40  ;;  %v357_v46 = vrot.slane %v356_v42, 2 }
 0x115   :  { %v351_v47 = vadd.f32 %v350_v44, %v349_v41 }
 0x116   :  { %v367_v48 = vrot.slane %v366_v45, 2  ;;  %v358_v50 = vadd.f32 %v357_v46, %v356_v42 }
 0x117   :  { %v352_v51 = vrot.slane %v351_v47, 1 }
 0x118   :  { %v368_v52 = vadd.f32 %v367_v48, %v366_v45  ;;  %v359_v53 = vrot.slane %v358_v50, 1 }
 0x119   :  { %v353_v54 = vadd.f32 %v352_v51, %v351_v47 }
 0x11a   :  { %v369_v55 = vrot.slane %v368_v52, 1  ;;  %v360_v56 = vadd.f32 %v359_v53, %v358_v50 }
 0x11b   :  { %v371_v57 = vadd.f32 %v353_v54, %v238_v4 }
 0x11c   :  { %v370_v58 = vadd.f32 %v369_v55, %v368_v52  ;;  %v372_v59 = vadd.f32 %v360_v56, %v240_v5 }
 0x11d   :  { %v377_v60 = vmin.f32 %v371_v57, 0.0  ;;  %vm374_vm8 = vcmp.gt.f32.partialorder %v371_v57, 0.0 }
 0x11e   :  { %v373_v61 = vadd.f32 %v1003_v49, %v370_v58  ;;  %v378_v62 = vmin.f32 %v372_v59, 0.0  ;;  %vm375_vm9 = vcmp.gt.f32.partialorder %v372_v59, 0.0 }
 0x11f   :  { %v380_v63 = vmul.f32 1.442695, %v377_v60 }
 0x120   :  { %v379_v0 = vmin.f32 %v373_v61, 0.0  ;;  %v382_v1 = vmul.f32 1.442695, %v378_v62  ;;  %vm376_vm10 = vcmp.gt.f32.partialorder %v373_v61, 0.0 }
 0x121   :  { %821 = vpow2.f32 %v380_v63 }
 0x122   :  { %v384_v2 = vmul.f32 1.442695, %v379_v0  ;;  %823 = vpow2.f32 %v382_v1 }
 0x124   :  { %825 = vpow2.f32 %v384_v2 }
 0x12b   :  { %v822_v3 = vpop.eup %821 }
 0x12c   :  { %v824_v6 = vpop.eup %823  ;;  %v667_v7 = vadd.f32 -1.0, %v822_v3 }
 0x12d   :  { %v668_v8 = vadd.f32 -1.0, %v824_v6 }
 0x12e   :  { %v826_v9 = vpop.eup %825  ;;  %v389_v4 = vsel %vm374_vm8, %v371_v57, %v667_v7 }
 0x12f   :  { %v390_v5 = vsel %vm375_vm9, %v372_v59, %v668_v8  ;;  %v669_v10 = vadd.f32 -1.0, %v826_v9  ;;  %v392_v49 = vpack.c.bf16 %v389_v4, %v389_v4 }
 0x130   :  { %v393_v11 = vpack.c.bf16 %v390_v5, %v390_v5 }
 0x131   :  { %v391_v12 = vsel %vm376_vm10, %v373_v61, %v669_v10 }
 0x132   :  { %575 = vmatprep.mubr.bf16.mxu0 %v393_v11  ;;  %v394_v13 = vpack.c.bf16 %v391_v12, %v391_v12 }
 0x133   :  { %576 = vmatmul.mubr.bf16.vlgmr.msra.gmra.mrb[8].mxu0 %v392_v49 }
 0x134   :  { %750 = vmatmul.mubr.msk.bf16.vlgmr.msra.gmra.mrb[4].mxu1 %vm361_vm7, %v394_v13 }
 0x206   :  { %v716_v14 = vpop.f32.mrb[8].mxu0 }
 0x207   :  { %v617_v15 = vpop.f32.mrb[4].mxu1  ;;  %v717_v17 = vpop.f32.mrb[9].mxu0 }
 0x208   :  { %v718_v18 = vadd.f32 %v717_v17, %v716_v14  ;;  %v751_v19 = vpop.f32.mrb[5].mxu1  ;;  %v719_v20 = vpop.f32.mrb[10].mxu0 }
 0x209   :  { %v620_v21 = vpop.f32.mrb[6].mxu1  ;;  %v720_v22 = vpop.f32.mrb[11].mxu0 }
 0x20a   :  { %v578_v23 = vadd.f32 %v718_v18, %v431_v16  ;;  %v752_v24 = vpop.f32.mrb[7].mxu1 }
 0x20c   :  { %v618_v25 = vadd.f32 %v617_v15, %v578_v23 }
 0x20e   :  { %v624_v26 = vmin.f32 %v618_v25, 0.0  ;;  %vm623_vm12 = vcmp.gt.f32.partialorder %v618_v25, 0.0 }
 0x210   :  { %v625_v27 = vmul.f32 1.442695, %v624_v26 }
 0x212   :  { %827 = vpow2.f32 %v625_v27 }
 0x21c   :  { %v828_v28 = vpop.eup %827 }
 0x21d   :  { %v689_v29 = vadd.f32 -1.0, %v828_v28 }
 0x21f   :  { %v628_v30 = vsel %vm623_vm12, %v618_v25, %v689_v29 }
 0x220   :  { %630 = vst.msk [vmem:[%s1020_s5] sm:$0x1] %vm629_vm11, %v628_v30 }

</bundles_post_ra>
